<compile_context>
chip_gen: v6e
topology: v6e:2x2x1
jax: 0.10.0
libtpu: 0.0.40
codegen_flags: <defaults>
</compile_context>

<pallas_src>
import math
from functools import partial

import jax
import jax.numpy as jnp
from jax.experimental import pallas as pl
from jax.experimental.pallas import tpu as pltpu

PRIOR_SIG = 0.15


# -----------------------------------------------------------------------------
# Small helpers (wrapper side, plain JAX)
# -----------------------------------------------------------------------------
def _round_up(x, m):
    return (x + m - 1) // m * m


def _pad2d(a, rows, cols):
    return jnp.pad(a, ((0, rows - a.shape[0]), (0, cols - a.shape[1])))


def _choose_tiles(m, k, n, tm=256, tk=256, tn=256):
    # Tile sizes sized for the v7x 64 MiB VMEM budget (comfortably fits v5e/v6e
    # too); clamp to the (padded) problem size for small shapes.
    TM = min(tm, _round_up(m, 8))
    TK = min(tk, _round_up(k, 128))
    TN = min(tn, _round_up(n, 128))
    return TM, TK, TN


def _vmem_limit_bytes(per_step_tile_bytes, scratch_bytes):
    # double-buffered tiles + persistent scratch, 4x headroom,
    # clamped to [8 MiB, 64 MiB] (v7x physical VMEM per TC).
    need = 2 * per_step_tile_bytes + scratch_bytes
    return int(min(max(4 * need, 8 * 2**20), 64 * 2**20))


def _softplus_thresh(x):
    # torch F.softplus(beta=1, threshold=20): returns x where x > 20
    return jnp.where(x > 20.0, x, jax.nn.softplus(x))


def _kld_cost(sig_p, mu_q, sig_q):
    return 0.5 * jnp.sum(
        2.0 * jnp.log(sig_p / sig_q) - 1.0 + (sig_q / sig_p) ** 2 + (mu_q / sig_p) ** 2
    )


# -----------------------------------------------------------------------------
# Kernels
# -----------------------------------------------------------------------------
def _det_kernel(x_ref, wmu_ref, bmu_ref, out_ref, acc_ref):
    """out = X @ W_mu + b_mu, tiled over (M, N, K)."""
    k = pl.program_id(2)

    @pl.when(k == 0)
    def _():
        acc_ref[...] = jnp.zeros_like(acc_ref)

    # native-dtype operands, f32 accumulation on the MXU
    acc_ref[...] += jnp.dot(x_ref[...], wmu_ref[...],
                            preferred_element_type=jnp.float32)

    @pl.when(k == pl.num_programs(2) - 1)
    def _():
        out = acc_ref[...] + bmu_ref[...].astype(jnp.float32)
        out_ref[...] = out.astype(out_ref.dtype)


def _sample_kernel(x_ref, wmu_ref, stdw2_ref, epsw_ref, bsamp_ref,
                   out_ref, acc_mu_ref, acc_var_ref):
    """out = X@W_mu + sqrt(max((X^2)@std_w^2, 1e-6))*eps_W + (b_mu + std_b*eps_b).

    Both dots share the same K loop and the same X tile (x*x is free VPU filler
    under the MXU-bound loop); sqrt / eps / bias epilogue only on the last K step.
    """
    k = pl.program_id(2)

    @pl.when(k == 0)
    def _():
        acc_mu_ref[...] = jnp.zeros_like(acc_mu_ref)
        acc_var_ref[...] = jnp.zeros_like(acc_var_ref)

    x = x_ref[...]
    acc_mu_ref[...] += jnp.dot(x, wmu_ref[...],
                               preferred_element_type=jnp.float32)
    acc_var_ref[...] += jnp.dot(x * x, stdw2_ref[...],
                                preferred_element_type=jnp.float32)

    @pl.when(k == pl.num_programs(2) - 1)
    def _():
        act_std = jnp.sqrt(jnp.maximum(acc_var_ref[...], 1e-6))
        out = (acc_mu_ref[...]
               + act_std * epsw_ref[...].astype(jnp.float32)
               + bsamp_ref[...].astype(jnp.float32))
        out_ref[...] = out.astype(out_ref.dtype)


# -----------------------------------------------------------------------------
# Wrappers
# -----------------------------------------------------------------------------
def bayes_linear_det(x, w_mu, b_mu, prior_sig=PRIOR_SIG):
    m, kdim = x.shape
    n = w_mu.shape[1]
    TM, TK, TN = _choose_tiles(m, kdim, n)
    Mp, Kp, Np = _round_up(m, TM), _round_up(kdim, TK), _round_up(n, TN)

    xp = _pad2d(x, Mp, Kp)
    wmu_p = _pad2d(w_mu, Kp, Np)
    bmu_p = _pad2d(b_mu.reshape(1, -1), 1, Np)

    grid = (Mp // TM, Np // TN, Kp // TK)
    itemsize = x.dtype.itemsize
    per_step_bytes = (TM * TK + TK * TN + TN + TM * TN) * itemsize
    scratch_bytes = TM * TN * 4
    cost = pl.CostEstimate(
        flops=2 * Mp * Kp * Np,
        transcendentals=0,
        bytes_accessed=(xp.size + wmu_p.size + bmu_p.size + Mp * Np) * itemsize,
    )

    out = pl.pallas_call(
        _det_kernel,
        out_shape=jax.ShapeDtypeStruct((Mp, Np), x.dtype),
        grid_spec=pltpu.PrefetchScalarGridSpec(
            num_scalar_prefetch=0,
            grid=grid,
            in_specs=[
                pl.BlockSpec((TM, TK), lambda i, j, kk: (i, kk)),
                pl.BlockSpec((TK, TN), lambda i, j, kk: (kk, j)),
                pl.BlockSpec((1, TN), lambda i, j, kk: (0, j)),
            ],
            out_specs=pl.BlockSpec((TM, TN), lambda i, j, kk: (i, j)),
            scratch_shapes=[pltpu.VMEM((TM, TN), jnp.float32)],
        ),
        compiler_params=pltpu.CompilerParams(
            dimension_semantics=("parallel", "parallel", "arbitrary"),
            vmem_limit_bytes=_vmem_limit_bytes(per_step_bytes, scratch_bytes),
        ),
        cost_estimate=cost,
    )(xp, wmu_p, bmu_p)
    out = out[:m, :n]

    # KLD hoisted out of the kernel (O(n_in*n_out) elementwise+reduce; XLA fuses).
    wf = w_mu.astype(jnp.float32)
    bf = b_mu.astype(jnp.float32)
    log_const = jnp.float32(math.log(prior_sig * math.sqrt(2.0 * math.pi)))
    kld = (jnp.sum(0.5 * (wf / prior_sig) ** 2 + log_const)
           + jnp.sum(0.5 * (bf / prior_sig) ** 2 + log_const))
    return out, kld


def bayes_linear_sample(x, w_mu, w_p, b_mu, b_p, eps_w, eps_b,
                        prior_sig=PRIOR_SIG):
    m, kdim = x.shape
    n = w_mu.shape[1]
    TM, TK, TN = _choose_tiles(m, kdim, n)
    Mp, Kp, Np = _round_up(m, TM), _round_up(kdim, TK), _round_up(n, TN)

    # softplus / std / bias-sample hoisted off the per-tile path (wrapper-side).
    std_w = 1e-6 + _softplus_thresh(w_p.astype(jnp.float32))
    std_b = 1e-6 + _softplus_thresh(b_p.astype(jnp.float32))
    std_w2 = (std_w * std_w).astype(x.dtype)
    b_sample = (b_mu.astype(jnp.float32) + std_b * eps_b.astype(jnp.float32))

    xp = _pad2d(x, Mp, Kp)
    wmu_p = _pad2d(w_mu, Kp, Np)
    stdw2_p = _pad2d(std_w2, Kp, Np)          # zero-padded -> no spurious variance
    epsw_p = _pad2d(eps_w, Mp, Np)
    bsamp_p = _pad2d(b_sample.reshape(1, -1).astype(x.dtype), 1, Np)

    grid = (Mp // TM, Np // TN, Kp // TK)
    itemsize = x.dtype.itemsize
    per_step_bytes = (TM * TK + 2 * TK * TN + TM * TN + TN + TM * TN) * itemsize
    scratch_bytes = 2 * TM * TN * 4
    cost = pl.CostEstimate(
        flops=4 * Mp * Kp * Np,
        transcendentals=0,
        bytes_accessed=(xp.size + wmu_p.size + stdw2_p.size + epsw_p.size
                        + bsamp_p.size + Mp * Np) * itemsize,
    )

    out = pl.pallas_call(
        _sample_kernel,
        out_shape=jax.ShapeDtypeStruct((Mp, Np), x.dtype),
        grid_spec=pltpu.PrefetchScalarGridSpec(
            num_scalar_prefetch=0,
            grid=grid,
            in_specs=[
                pl.BlockSpec((TM, TK), lambda i, j, kk: (i, kk)),
                pl.BlockSpec((TK, TN), lambda i, j, kk: (kk, j)),
                pl.BlockSpec((TK, TN), lambda i, j, kk: (kk, j)),
                pl.BlockSpec((TM, TN), lambda i, j, kk: (i, j)),
                pl.BlockSpec((1, TN), lambda i, j, kk: (0, j)),
            ],
            out_specs=pl.BlockSpec((TM, TN), lambda i, j, kk: (i, j)),
            scratch_shapes=[pltpu.VMEM((TM, TN), jnp.float32),
                            pltpu.VMEM((TM, TN), jnp.float32)],
        ),
        compiler_params=pltpu.CompilerParams(
            dimension_semantics=("parallel", "parallel", "arbitrary"),
            vmem_limit_bytes=_vmem_limit_bytes(per_step_bytes, scratch_bytes),
        ),
        cost_estimate=cost,
    )(xp, wmu_p, stdw2_p, epsw_p, bsamp_p)
    out = out[:m, :n]

    # KLD on the un-padded params (wrapper-side; avoids padding-mask pitfalls).
    kld = (_kld_cost(prior_sig, w_mu.astype(jnp.float32), std_w)
           + _kld_cost(prior_sig, b_mu.astype(jnp.float32), std_b))
    return out, kld


# -----------------------------------------------------------------------------
# Demo / correctness check
# -----------------------------------------------------------------------------
if __name__ == "__main__":
    # Small shapes: batch N=8, n_in=32, n_out=64
    N, N_IN, N_OUT = 8, 32, 64
    key = jax.random.PRNGKey(0)
    kx, kw, kb, kwp, kbp, kew, keb = jax.random.split(key, 7)

    x = jax.random.normal(kx, (N, N_IN), dtype=jnp.float32)

    # __init__: uniform(-0.02, 0.02) for W_mu / b_mu
    w_mu = jax.random.uniform(kw, (N_IN, N_OUT), minval=-0.02, maxval=0.02,
                              dtype=jnp.float32)
    b_mu = jax.random.uniform(kb, (N_OUT,), minval=-0.02, maxval=0.02,
                              dtype=jnp.float32)
    # init_rho(p_min=-3, p_max=-2) for W_p / b_p
    w_p = jax.random.uniform(kwp, (N_IN, N_OUT), minval=-3.0, maxval=-2.0,
                             dtype=jnp.float32)
    b_p = jax.random.uniform(kbp, (N_OUT,), minval=-3.0, maxval=-2.0,
                             dtype=jnp.float32)

    # TODO(synk): torch draws eps via the parameter's .normal_() generator; here
    # the standard-normal noise is drawn with jax.random instead (same dist).
    eps_w = jax.random.normal(kew, (N, N_OUT), dtype=jnp.float32)
    eps_b = jax.random.normal(keb, (N_OUT,), dtype=jnp.float32)

    # ---- deterministic (sample=False) path ----
    out_det, kld_det = bayes_linear_det(x, w_mu, b_mu)
    out_det = jax.block_until_ready(out_det)
    kld_det = jax.block_until_ready(kld_det)

    ref_out = x @ w_mu + b_mu[None, :]
    log_const = math.log(PRIOR_SIG * math.sqrt(2.0 * math.pi))
    ref_kld = (jnp.sum(0.5 * (w_mu / PRIOR_SIG) ** 2 + log_const)
               + jnp.sum(0.5 * (b_mu / PRIOR_SIG) ** 2 + log_const))
    assert jnp.allclose(out_det, ref_out, atol=1e-4, rtol=1e-4)
    assert jnp.allclose(kld_det, ref_kld, atol=1e-3, rtol=1e-4)

    # ---- stochastic (sample=True) path ----
    out_s, kld_s = bayes_linear_sample(x, w_mu, w_p, b_mu, b_p, eps_w, eps_b)
    out_s = jax.block_until_ready(out_s)
    kld_s = jax.block_until_ready(kld_s)

    std_w_ref = 1e-6 + jax.nn.softplus(w_p)
    std_b_ref = 1e-6 + jax.nn.softplus(b_p)
    ref_out_s = (x @ w_mu
                 + jnp.sqrt(jnp.maximum((x ** 2) @ (std_w_ref ** 2), 1e-6)) * eps_w
                 + (b_mu + std_b_ref * eps_b)[None, :])
    ref_kld_s = (0.5 * jnp.sum(2 * jnp.log(PRIOR_SIG / std_w_ref) - 1
                               + (std_w_ref / PRIOR_SIG) ** 2
                               + (w_mu / PRIOR_SIG) ** 2)
                 + 0.5 * jnp.sum(2 * jnp.log(PRIOR_SIG / std_b_ref) - 1
                                 + (std_b_ref / PRIOR_SIG) ** 2
                                 + (b_mu / PRIOR_SIG) ** 2))
    assert jnp.allclose(out_s, ref_out_s, atol=1e-4, rtol=1e-4)
    assert jnp.allclose(kld_s, ref_kld_s, atol=1e-3, rtol=1e-4)

    print("KERNEL_OK")
</pallas_src>

<mosaic_0001>
module attributes {stable_mosaic.version = 11 : i64} {
  func.func @_det_kernel(%arg0: i32, %arg1: i32, %arg2: i32, %arg3: memref<8x128xf32, #tpu.memory_space<vmem>>, %arg4: memref<128x128xf32, #tpu.memory_space<vmem>>, %arg5: memref<1x128xf32, #tpu.memory_space<vmem>>, %arg6: memref<8x128xf32, #tpu.memory_space<vmem>>, %arg7: memref<8x128xf32, #tpu.memory_space<vmem>>) attributes {dimension_semantics = [#tpu.dimension_semantics<parallel>, #tpu.dimension_semantics<parallel>, #tpu.dimension_semantics<arbitrary>], iteration_bounds = array<i64: 1, 1, 1>, scalar_prefetch = 0 : i64, scratch_operands = 1 : i64, tpu.core_type = #tpu.core_type<tc>, window_params = [{transform_indices = @transform_0, window_bounds = array<i64: 8, 128>}, {transform_indices = @transform_1, window_bounds = array<i64: 128, 128>}, {transform_indices = @transform_2, window_bounds = array<i64: 1, 128>}, {transform_indices = @transform_3, window_bounds = array<i64: 8, 128>}]} {
    %c0_i32 = arith.constant 0 : i32
    %0 = arith.cmpi eq, %arg2, %c0_i32 : i32
    %1 = arith.extui %0 : i1 to i32
    %c0_i32_0 = arith.constant 0 : i32
    %2 = arith.cmpi ne, %1, %c0_i32_0 : i32
    scf.if %2 {
      %cst_10 = arith.constant 0.000000e+00 : f32
      %12 = vector.broadcast %cst_10 : f32 to vector<8x128xf32>
      %c0_11 = arith.constant 0 : index
      %c0_12 = arith.constant 0 : index
      %13 = vector.load %arg7[%c0_11, %c0_12] : memref<8x128xf32, #tpu.memory_space<vmem>>, vector<8x128xf32>
      tpu.vector_store %arg7[%c0_11, %c0_12], %12 {strides = array<i32>} : memref<8x128xf32, #tpu.memory_space<vmem>>, vector<8x128xf32>,
    } else {
    }
    %c0 = arith.constant 0 : index
    %c0_1 = arith.constant 0 : index
    %3 = vector.load %arg7[%c0, %c0_1] : memref<8x128xf32, #tpu.memory_space<vmem>>, vector<8x128xf32>
    %c0_2 = arith.constant 0 : index
    %c0_3 = arith.constant 0 : index
    %4 = vector.load %arg3[%c0_2, %c0_3] : memref<8x128xf32, #tpu.memory_space<vmem>>, vector<8x128xf32>
    %c0_4 = arith.constant 0 : index
    %c0_5 = arith.constant 0 : index
    %5 = vector.load %arg4[%c0_4, %c0_5] : memref<128x128xf32, #tpu.memory_space<vmem>>, vector<128x128xf32>
    %cst = arith.constant dense<0.000000e+00> : vector<8x128xf32>
    %6 = tpu.matmul %4, %5, %cst {dimension_numbers = #tpu.dot_dimension_numbers<[1], [0], [0], [1], [0, 0, 1, 1], [], []>} : vector<8x128xf32>, vector<128x128xf32>, vector<8x128xf32> -> vector<8x128xf32>
    %7 = arith.addf %3, %6 : vector<8x128xf32>
    %c0_6 = arith.constant 0 : index
    %c0_7 = arith.constant 0 : index
    %8 = vector.load %arg7[%c0_6, %c0_7] : memref<8x128xf32, #tpu.memory_space<vmem>>, vector<8x128xf32>
    tpu.vector_store %arg7[%c0_6, %c0_7], %7 {strides = array<i32>} : memref<8x128xf32, #tpu.memory_space<vmem>>, vector<8x128xf32>,
    %c0_i32_8 = arith.constant 0 : i32
    %9 = arith.cmpi eq, %arg2, %c0_i32_8 : i32
    %10 = arith.extui %9 : i1 to i32
    %c0_i32_9 = arith.constant 0 : i32
    %11 = arith.cmpi ne, %10, %c0_i32_9 : i32
    scf.if %11 {
      %c0_10 = arith.constant 0 : index
      %c0_11 = arith.constant 0 : index
      %12 = vector.load %arg7[%c0_10, %c0_11] : memref<8x128xf32, #tpu.memory_space<vmem>>, vector<8x128xf32>
      %c0_12 = arith.constant 0 : index
      %c0_13 = arith.constant 0 : index
      %13 = vector.load %arg5[%c0_12, %c0_13] : memref<1x128xf32, #tpu.memory_space<vmem>>, vector<1x128xf32>
      %14 = vector.broadcast %13 : vector<1x128xf32> to vector<8x128xf32>
      %15 = arith.addf %12, %14 : vector<8x128xf32>
      %c0_14 = arith.constant 0 : index
      %c0_15 = arith.constant 0 : index
      %16 = vector.load %arg6[%c0_14, %c0_15] : memref<8x128xf32, #tpu.memory_space<vmem>>, vector<8x128xf32>
      tpu.vector_store %arg6[%c0_14, %c0_15], %15 {strides = array<i32>} : memref<8x128xf32, #tpu.memory_space<vmem>>, vector<8x128xf32>,
    } else {
    }
    return
  }
  func.func @transform_0(%arg0: i32, %arg1: i32, %arg2: i32) -> (i32, i32) {
    %c0_i32 = arith.constant 0 : i32
    return %arg0, %arg2 : i32, i32
  }
  func.func @transform_1(%arg0: i32, %arg1: i32, %arg2: i32) -> (i32, i32) {
    %c0_i32 = arith.constant 0 : i32
    return %arg2, %arg1 : i32, i32
  }
  func.func @transform_2(%arg0: i32, %arg1: i32, %arg2: i32) -> (i32, i32) {
    %c0_i32 = arith.constant 0 : i32
    %c0_i32_0 = arith.constant 0 : i32
    return %c0_i32, %arg1 : i32, i32
  }
  func.func @transform_3(%arg0: i32, %arg1: i32, %arg2: i32) -> (i32, i32) {
    %c0_i32 = arith.constant 0 : i32
    return %arg0, %arg1 : i32, i32
  }
}

</mosaic_0001>

<bundles_post_ra>
// kernel: tpu_custom_call.1
= control target key start
LH: loop header
LB: loop body
LE: loop exit
PB: predicated region body
PF: predicated region fallthrough
CT: control target
= control target key end

     0   :  { %8 = vsyncpa [#allocation4], 0  ;;  %s330_s0 = inlined_call_operand.hbm [shape: f32[8,128], index: 0, kind: input, shape index: {}]   ;;  %s331_s1 = inlined_call_operand.hbm [shape: f32[128,128], index: 1, kind: input, shape index: {}]   ;;  %s332_s2 = inlined_call_operand.vmem [shape: f32[1,128], index: 2, kind: input, shape index: {}]   ;;  %s333_s3 = inlined_call_operand.hbm [shape: f32[8,128], index: 3, kind: output, shape index: {}]  }
   0x1   :  { %9 = vsyncpa [#allocation7], 0 }
   0x2   :  { %10 = vsyncpa [#allocation5], 0  ;;  %s291_s12 = smov [#allocation3]   ;;  %s292_s14 = smov [#allocation6]  }
   0x3   :  { %s17_s13 = sshll.u32 %s291_s12, 4  ;;  %s26_s15 = sshll.u32 %s292_s14, 4  ;;  %s18_s13 = int_to_ptr.vmem [resolvable:$true] %s17_s13  ;;  %s27_s15 = int_to_ptr.vmem [resolvable:$true] %s26_s15 }
   0x4   :  { %s233_s16 = scalar_lea.vmem %s18_s13, 128  ;;  %p238_p1 = scmp.lt.s32.totalorder %s18_s13, %s18_s13 }
   0x5   :  { %p234_p0 = scmp.ne.s32.totalorder %s18_s13, %s233_s16  ;;  %p239_p2 = scmp.lt.s32.totalorder %s233_s16, %s233_s16 }
   0x7   :  { %p240_p3 = por %p239_p2, %p238_p1 }
   0x9   :  { %p241_p4 = pnand %p240_p3, %p234_p0 }
   0xb   :  { %244 = shalt.err (!%p241_p4)
}
   0xc   :  { %20 = dma.hbm_to_vmem [thread:$0]  %s330_s0, 128, %s18_s13, [#allocation4]  }
   0xd   :  { %s253_s19 = scalar_lea.vmem %s27_s15, 2048  ;;  %p258_p6 = scmp.lt.s32.totalorder %s27_s15, %s27_s15 }
   0xe   :  { %p254_p5 = scmp.ne.s32.totalorder %s27_s15, %s253_s19  ;;  %p259_p7 = scmp.lt.s32.totalorder %s253_s19, %s253_s19 }
  0x10   :  { %p260_p8 = por %p259_p7, %p258_p6 }
  0x12   :  { %p261_p9 = pnand %p260_p8, %p254_p5 }
  0x14   :  { %264 = shalt.err (!%p261_p9)
}
  0x15   :  { %s293_s20 = smov 128   ;;  %s294_s21 = smov 8  }
  0x16   :  { %32 = dma.hbm_to_vmem [thread:$0]  %s331_s1, 2048, %s27_s15, [#allocation7], %s293_s20, %s293_s20, %s294_s21  }
  0x17   :  { %285 = dma.done.wait [#allocation4], 128  }
  0x18   :  { %286 = vsyncadd [#allocation4], 4294967168 }
  0x19   :  { %287 = dma.done.wait [#allocation7], 2048  }
  0x1a   :  { %288 = vsyncadd [#allocation7], 4294965248  ;;  %v295_v0 = vmov 0.0   ;;  %vm296_vm0 = vmmov 0   ;;  %v63_v1 = vld [vmem:[#allocation6 + $0x78] sm:$0xff]  ;;  %v62_v2 = vld [vmem:[#allocation6 + $0x70] sm:$0xff] }
  0x1b   :  { %183 = vmatprep.subr.mxu0 %v295_v0  ;;  %215 = vmatprep.mubr.msk.f32.mxu0 %vm296_vm0, %v295_v0  ;;  %v61_v3 = vld [vmem:[#allocation6 + $0x68] sm:$0xff]  ;;  %v60_v4 = vld [vmem:[#allocation6 + $0x60] sm:$0xff]  ;;  %v59_v5 = vld [vmem:[#allocation6 + $0x58] sm:$0xff]  ;;  %s297_s24 = smov [#allocation8]  }
  0x1c   :  { %184 = vmatpush3.msra.mxu0 %v63_v1  ;;  %v58_v6 = vld [vmem:[#allocation6 + $0x50] sm:$0xff]  ;;  %v57_v7 = vld [vmem:[#allocation6 + $0x48] sm:$0xff]  ;;  %v56_v8 = vld [vmem:[#allocation6 + $0x40] sm:$0xff]  ;;  %s155_s25 = sshll.u32 %s297_s24, 4  ;;  %s156_s25 = int_to_ptr.vmem [resolvable:$true] %s155_s25 }
  0x1d   :  { %185 = vmatprep.subr.mxu0 %v295_v0  ;;  %v55_v9 = vld [vmem:[#allocation6 + $0x38] sm:$0xff]  ;;  %v54_v10 = vld [vmem:[#allocation6 + $0x30] sm:$0xff]  ;;  %v53_v11 = vld [vmem:[#allocation6 + $0x28] sm:$0xff]  ;;  %s265_s26 = scalar_lea.vmem %s156_s25, 128  ;;  %p270_p11 = scmp.lt.s32.totalorder %s156_s25, %s156_s25 }
  0x1e   :  { %186 = vmatpush3.msra.mxu0 %v62_v2  ;;  %v52_v12 = vld [vmem:[#allocation6 + $0x20] sm:$0xff]  ;;  %v51_v13 = vld [vmem:[#allocation6 + $0x18] sm:$0xff]  ;;  %v50_v14 = vld [vmem:[#allocation6 + $0x10] sm:$0xff]  ;;  %p266_p10 = scmp.ne.s32.totalorder %s156_s25, %s265_s26  ;;  %p271_p12 = scmp.lt.s32.totalorder %s265_s26, %s265_s26 }
  0x1f   :  { %187 = vmatprep.subr.mxu0 %v295_v0  ;;  %v49_v15 = vld [vmem:[#allocation6 + $0x8] sm:$0xff]  ;;  %v48_v16 = vld [vmem:[#allocation6] sm:$0xff]  ;;  %v47_v17 = vld [vmem:[#allocation3] sm:$0xff] }
  0x20   :  { %188 = vmatpush3.msra.mxu0 %v61_v3  ;;  %v165_v18 = vld [vmem:[%s332_s2] ss:$0 sm:$0xff]  ;;  %p272_p13 = por %p271_p12, %p270_p11 }
  0x21   :  { %189 = vmatprep.subr.mxu0 %v295_v0 }
  0x22   :  { %190 = vmatpush3.msra.mxu0 %v60_v4  ;;  %p273_p0 = pnand %p272_p13, %p266_p10 }
  0x23   :  { %191 = vmatprep.subr.mxu0 %v295_v0 }
  0x24   :  { %192 = vmatpush3.msra.mxu0 %v59_v5 }
  0x25   :  { %193 = vmatprep.subr.mxu0 %v295_v0 }
  0x26   :  { %194 = vmatpush3.msra.mxu0 %v58_v6 }
  0x27   :  { %195 = vmatprep.subr.mxu0 %v295_v0 }
  0x28   :  { %196 = vmatpush3.msra.mxu0 %v57_v7 }
  0x29   :  { %197 = vmatprep.subr.mxu0 %v295_v0 }
  0x2a   :  { %198 = vmatpush3.msra.mxu0 %v56_v8 }
  0x2b   :  { %199 = vmatprep.subr.mxu0 %v295_v0 }
  0x2c   :  { %200 = vmatpush3.msra.mxu0 %v55_v9 }
  0x2d   :  { %201 = vmatprep.subr.mxu0 %v295_v0 }
  0x2e   :  { %202 = vmatpush3.msra.mxu0 %v54_v10 }
  0x2f   :  { %203 = vmatprep.subr.mxu0 %v295_v0 }
  0x30   :  { %204 = vmatpush3.msra.mxu0 %v53_v11 }
  0x31   :  { %205 = vmatprep.subr.mxu0 %v295_v0 }
  0x32   :  { %206 = vmatpush3.msra.mxu0 %v52_v12 }
  0x33   :  { %207 = vmatprep.subr.mxu0 %v295_v0 }
  0x34   :  { %208 = vmatpush3.msra.mxu0 %v51_v13 }
  0x35   :  { %209 = vmatprep.subr.mxu0 %v295_v0 }
  0x36   :  { %210 = vmatpush3.msra.mxu0 %v50_v14 }
  0x37   :  { %211 = vmatprep.subr.mxu0 %v295_v0 }
  0x38   :  { %212 = vmatpush3.msra.mxu0 %v49_v15 }
  0x39   :  { %213 = vmatprep.subr.mxu0 %v295_v0 }
  0x3a   :  { %214 = vmatpush3.msra.mxu0 %v48_v16 }
  0x3b   :  { %216 = vmatmul.mubr.f32.vlgmr.msra.gmra.mxu0 %v47_v17 }
  0xfb   :  { %v130_v19 = vpop.f32.mrf.mxu0 }
  0xfc   :  { %v147_v20 = vadd.f32 %v165_v18, %v130_v19 }
  0xfd   :  { %v217_v21 = vpop.f32.mrf.mxu0 }
  0xfe   :  { %148 = vst [vmem:[#allocation8] sm:$0xff] %v147_v20 }
  0xff   :  { %276 = shalt.err (!%p273_p0)
}
 0x100   :  { %158 = dma.vmem_to_hbm [thread:$0]  %s156_s25, 128, %s333_s3, [#allocation5]  }
 0x101   :  { %289 = dma.done.wait [#allocation5], 128  }
 0x102   :  { %290 = vsyncadd [#allocation5], 4294967168 }
 0x103   :  { %162 = vsyncpa [#allocation4], 1 }
 0x104   :  { %163 = vsyncpa [#allocation7], 1 }
 0x105   :  { %164 = vsyncpa [#allocation5], 1 }

</bundles_post_ra>
